<compile_context>
chip_gen: v6e
topology: v6e:2x2x1
jax: 0.10.0
libtpu: 0.0.40
codegen_flags: <defaults>
</compile_context>

<pallas_src>
import functools

import jax
import jax.numpy as jnp
from jax.experimental import pallas as pl
from jax.experimental.pallas import tpu as pltpu

EPS = 1e-7


def _loss_kernel(yp_ref, yt_ref, out_ref, *, hw, tile_hw, tiles_per_core, mask_needed):
    t = pl.program_id(2)

    @pl.when(t == 0)
    def _():
        out_ref[...] = jnp.zeros_like(out_ref)

    def accumulate(valid):
        yp = yp_ref[0].astype(jnp.float32)   # (C, tile_hw): classes on sublanes, positions on lanes
        yt = yt_ref[0].astype(jnp.float32)
        if valid is not None:
            # Mask BEFORE exp/log: garbage past-the-end lanes could overflow exp / NaN the log.
            yp = jnp.where(valid, yp, 0.0)
            yt = jnp.where(valid, yt, 0.0)

        # softmax / log_softmax over the class (sublane) axis.
        m = jnp.max(yp, axis=0, keepdims=True)        # (1, tile_hw)
        z = yp - m
        ez = jnp.exp(z)
        se = jnp.sum(ez, axis=0, keepdims=True)
        ls = z - jnp.log(se)                          # log_softmax (2nd log_softmax elided: idempotent)
        # CE partial first: ends `ls`'s live range before s/d exist (vreg pressure at large C).
        out_ref[0, 0, 3, :] += jnp.sum(-yt * ls, axis=-1)

        r = pl.reciprocal(se, approx=True)            # EUP seed (free slot) ...
        r = r * (2.0 - se * r)                        # ... + one Newton step -> ~f32-exact 1/se
        s = ez * r                                    # softmax(y_pred)
        if valid is not None:
            s = jnp.where(valid, s, 0.0)              # padded lanes must not contribute to sums

        # Per-step lane (XLU) reductions straight into the tiny resident output block.
        out_ref[0, 0, 0, :] += jnp.sum(yt, axis=-1)          # per-class target sum
        out_ref[0, 0, 1, :] += jnp.sum(yt * s, axis=-1)      # dice intersection
        out_ref[0, 0, 2, :] += jnp.sum(s, axis=-1)           # softmax sum (cardinality = [0] + [2])
        d = s - yt
        out_ref[0, 0, 4, :] += jnp.sum(d * d, axis=-1)       # squared error

    if not mask_needed:
        accumulate(None)
    else:
        gt = pl.program_id(1) * tiles_per_core + t    # global spatial-tile index
        num_full = hw // tile_hw                      # tiles fully in-bounds: no mask cost

        @pl.when(gt < num_full)
        def _():
            accumulate(None)

        if hw % tile_hw != 0:
            @pl.when(gt == num_full)                  # the single ragged tile: masked (cold) path
            def _():
                pos = gt * tile_hw + jax.lax.broadcasted_iota(jnp.int32, (1, tile_hw), 1)
                accumulate(pos < hw)
        # gt > num_full (core-split padding): block index is clamped in the index_map and the
        # step is skipped entirely (only fixed per-step overhead).


def _vmem_budget_bytes():
    cap = 128 * 1024 * 1024
    try:
        info = pltpu.get_tpu_info()
        cap = int(getattr(info, "vmem_capacity_bytes", cap) or cap)
    except Exception:
        pass
    # ~48 MiB on 128-MiB parts (v5e/v6e), ~32 MiB on 64-MiB parts (v7x); leaves headroom.
    return min(cap // 2, 48 * 1024 * 1024)


def _pick_tile_hw(hw, c, itemsize, budget_bytes):
    # Per lane element: 2 inputs x 2 pipeline buffers x itemsize, plus an allowance for
    # ~6 f32 element-wise temporaries (z, ez, s, ls, products) the compiler materializes.
    cp = -(-c // 8) * 8
    per_lane = cp * (2 * 2 * itemsize + 6 * 4)
    cap = (budget_bytes // per_lane) // 128 * 128
    cap = max(128, min(cap, 128 * 1024))
    if hw % 128 == 0:
        return min(cap, hw)
    if hw <= cap:
        return hw           # single full-width tile (block last dim == full array dim)
    return cap              # multiple of 128; ragged last tile is masked in-kernel


def cell_dice_ce_mse_loss(y_pred, y_true, *, tile_hw=None):
    assert y_pred.shape == y_true.shape
    B, C, H, W = y_pred.shape
    HW = H * W

    yp = y_pred.reshape(B, C, HW)   # free reshape, no transpose
    yt = y_true.reshape(B, C, HW)

    itemsize = max(jnp.dtype(y_pred.dtype).itemsize, jnp.dtype(y_true.dtype).itemsize)
    vmem_limit = _vmem_budget_bytes()
    if tile_hw is None:
        tile_hw = _pick_tile_hw(HW, C, itemsize, int(vmem_limit * 0.9))
    assert tile_hw == HW or tile_hw % 128 == 0

    num_tiles = -(-HW // tile_hw)
    # 2-way spatial core-split (v7x megacore) only when the batch axis alone can't balance
    # the two TensorCores (B == 1 or odd). No effect on v5e/v6e (single TC).
    split = 2 if (num_tiles >= 2 and B % 2 == 1) else 1
    tiles_per_core = -(-num_tiles // split)
    mask_needed = (HW % tile_hw != 0) or (split * tiles_per_core != num_tiles)

    if split * tiles_per_core == num_tiles:
        in_idx = lambda b, cc, t: (b, 0, cc * tiles_per_core + t)
    else:
        # Padded core-split steps: clamp to the last real block (kernel skips the step).
        in_idx = lambda b, cc, t: (b, 0, jnp.minimum(cc * tiles_per_core + t, num_tiles - 1))

    kernel = functools.partial(
        _loss_kernel, hw=HW, tile_hw=tile_hw,
        tiles_per_core=tiles_per_core, mask_needed=mask_needed)

    partials = pl.pallas_call(
        kernel,
        out_shape=jax.ShapeDtypeStruct((B, split, 5, C), jnp.float32),
        grid_spec=pltpu.PrefetchScalarGridSpec(
            num_scalar_prefetch=0,
            grid=(B, split, tiles_per_core),
            in_specs=[
                pl.BlockSpec((1, C, tile_hw), in_idx),
                pl.BlockSpec((1, C, tile_hw), in_idx),
            ],
            out_specs=pl.BlockSpec((1, 1, 5, C), lambda b, cc, t: (b, cc, 0, 0)),
        ),
        compiler_params=pltpu.CompilerParams(
            dimension_semantics=("parallel", "parallel", "arbitrary"),
            vmem_limit_bytes=int(vmem_limit)),
    )(yp, yt)

    # Tiny final combine (plain JAX) over the (B, split, 5, C) per-(batch, core) partials.
    p = jnp.sum(partials, axis=(0, 1))                       # (5, C)
    ysum, inter, ssum, ce_s, sq_s = p[0], p[1], p[2], p[3], p[4]
    card = ysum + ssum
    mask = (ysum > 0.0).astype(jnp.float32)
    dice = jnp.mean((1.0 - 2.0 * inter / jnp.maximum(card, EPS)) * mask)
    total = B * HW
    ce = jnp.sum(ce_s) / total
    mse = jnp.sum(sq_s) / (total * C)
    return ce + dice + mse


def _reference(y_pred, y_true):
    # pure-JAX reference mirroring the PyTorch module (incl. its double log_softmax)
    s = jax.nn.softmax(y_pred, axis=1)
    ls = jax.nn.log_softmax(y_pred, axis=1)
    lls = jax.nn.log_softmax(ls, axis=1)
    ce = jnp.mean(jnp.sum(-y_true * lls, axis=1))
    mse = jnp.mean((s - y_true) ** 2)
    ysum = jnp.sum(y_true, axis=(0, 2, 3))
    inter = jnp.sum(y_true * s, axis=(0, 2, 3))
    card = jnp.sum(y_true + s, axis=(0, 2, 3))
    mask = (ysum > 0).astype(jnp.float32)
    dice = jnp.mean((1.0 - 2.0 * inter / jnp.maximum(card, EPS)) * mask)
    return ce + dice + mse


if __name__ == "__main__":
    key = jax.random.PRNGKey(0)
    k1, k2, k3, k4 = jax.random.split(key, 4)

    # Case 1: canonical small shape (single tile, unmasked fast path).
    B, C, H, W = 2, 4, 16, 16
    y_pred = jax.random.normal(k1, (B, C, H, W), dtype=jnp.float32)
    # soft probability targets (valid for F.cross_entropy's probability mode)
    y_true = jax.nn.softmax(
        jax.random.normal(k2, (B, C, H, W), dtype=jnp.float32), axis=1)
    out = jax.block_until_ready(cell_dice_ce_mse_loss(y_pred, y_true))
    ref = _reference(y_pred, y_true)
    assert jnp.allclose(out, ref, rtol=1e-5, atol=1e-5), (out, ref)

    # Case 2: small shape with a tile override to exercise multi-tile accumulation,
    # the 2-way core split, the clamped padded step and the masked ragged tile.
    B, C, H, W = 1, 5, 18, 20
    y_pred = jax.random.normal(k3, (B, C, H, W), dtype=jnp.float32)
    y_true = jax.nn.softmax(
        jax.random.normal(k4, (B, C, H, W), dtype=jnp.float32), axis=1)
    out = jax.block_until_ready(cell_dice_ce_mse_loss(y_pred, y_true, tile_hw=128))
    ref = _reference(y_pred, y_true)
    assert jnp.allclose(out, ref, rtol=1e-5, atol=1e-5), (out, ref)

    print("KERNEL_OK")
</pallas_src>

<mosaic_0001>
module attributes {stable_mosaic.version = 11 : i64} {
  func.func @_loss_kernel(%arg0: i32, %arg1: i32, %arg2: i32, %arg3: memref<1x4x256xf32, #tpu.memory_space<vmem>>, %arg4: memref<1x4x256xf32, #tpu.memory_space<vmem>>, %arg5: memref<1x1x5x4xf32, #tpu.memory_space<vmem>>) attributes {dimension_semantics = [#tpu.dimension_semantics<parallel>, #tpu.dimension_semantics<parallel>, #tpu.dimension_semantics<arbitrary>], iteration_bounds = array<i64: 2, 1, 1>, scalar_prefetch = 0 : i64, scratch_operands = 0 : i64, tpu.core_type = #tpu.core_type<tc>, window_params = [{transform_indices = @transform_0, window_bounds = array<i64: 1, 4, 256>}, {transform_indices = @transform_1, window_bounds = array<i64: 1, 4, 256>}, {transform_indices = @transform_2, window_bounds = array<i64: 1, 1, 5, 4>}]} {
    %c0_i32 = arith.constant 0 : i32
    %0 = arith.cmpi eq, %arg2, %c0_i32 : i32
    %1 = arith.extui %0 : i1 to i32
    %c0_i32_0 = arith.constant 0 : i32
    %2 = arith.cmpi ne, %1, %c0_i32_0 : i32
    scf.if %2 {
      %cst_50 = arith.constant 0.000000e+00 : f32
      %65 = vector.broadcast %cst_50 : f32 to vector<1x1x5x4xf32>
      %c0_51 = arith.constant 0 : index
      %c0_52 = arith.constant 0 : index
      %c0_53 = arith.constant 0 : index
      %c0_54 = arith.constant 0 : index
      %66 = vector.load %arg5[%c0_51, %c0_52, %c0_53, %c0_54] : memref<1x1x5x4xf32, #tpu.memory_space<vmem>>, vector<1x1x5x4xf32>
      tpu.vector_store %arg5[%c0_51, %c0_52, %c0_53, %c0_54], %65 {strides = array<i32>} : memref<1x1x5x4xf32, #tpu.memory_space<vmem>>, vector<1x1x5x4xf32>,
    } else {
    }
    %c0 = arith.constant 0 : index
    %c0_1 = arith.constant 0 : index
    %c0_2 = arith.constant 0 : index
    %3 = vector.load %arg3[%c0, %c0_1, %c0_2] : memref<1x4x256xf32, #tpu.memory_space<vmem>>, vector<1x4x256xf32>
    %4 = vector.shape_cast %3 : vector<1x4x256xf32> to vector<4x256xf32>
    %c0_3 = arith.constant 0 : index
    %c0_4 = arith.constant 0 : index
    %c0_5 = arith.constant 0 : index
    %5 = vector.load %arg4[%c0_3, %c0_4, %c0_5] : memref<1x4x256xf32, #tpu.memory_space<vmem>>, vector<1x4x256xf32>
    %6 = vector.shape_cast %5 : vector<1x4x256xf32> to vector<4x256xf32>
    %cst = arith.constant dense<0xFF800000> : vector<256xf32>
    %7 = vector.multi_reduction <maximumf>, %4, %cst [0] : vector<4x256xf32> to vector<256xf32>
    %8 = vector.shape_cast %7 : vector<256xf32> to vector<1x256xf32>
    %9 = vector.broadcast %8 : vector<1x256xf32> to vector<4x256xf32>
    %10 = arith.subf %4, %9 : vector<4x256xf32>
    %11 = math.exp %10 : vector<4x256xf32>
    %cst_6 = arith.constant dense<0.000000e+00> : vector<256xf32>
    %12 = vector.multi_reduction <add>, %11, %cst_6 [0] : vector<4x256xf32> to vector<256xf32>
    %13 = vector.shape_cast %12 : vector<256xf32> to vector<1x256xf32>
    %14 = math.log %13 : vector<1x256xf32>
    %15 = vector.broadcast %14 : vector<1x256xf32> to vector<4x256xf32>
    %16 = arith.subf %10, %15 : vector<4x256xf32>
    %c0_7 = arith.constant 0 : index
    %c0_8 = arith.constant 0 : index
    %c3 = arith.constant 3 : index
    %c0_9 = arith.constant 0 : index
    %17 = vector.load %arg5[%c0_7, %c0_8, %c3, %c0_9] : memref<1x1x5x4xf32, #tpu.memory_space<vmem>>, vector<1x1x1x4xf32>
    %18 = vector.shape_cast %17 : vector<1x1x1x4xf32> to vector<4xf32>
    %cst_10 = arith.constant 0.000000e+00 : f32
    %19 = vector.broadcast %cst_10 : f32 to vector<4x256xf32>
    %20 = arith.subf %19, %6 : vector<4x256xf32>
    %21 = arith.mulf %20, %16 : vector<4x256xf32>
    %cst_11 = arith.constant dense<0.000000e+00> : vector<4xf32>
    %22 = vector.multi_reduction <add>, %21, %cst_11 [1] : vector<4x256xf32> to vector<4xf32>
    %23 = arith.addf %18, %22 : vector<4xf32>
    %c0_12 = arith.constant 0 : index
    %c0_13 = arith.constant 0 : index
    %c3_14 = arith.constant 3 : index
    %c0_15 = arith.constant 0 : index
    %24 = vector.load %arg5[%c0_12, %c0_13, %c3_14, %c0_15] : memref<1x1x5x4xf32, #tpu.memory_space<vmem>>, vector<1x1x1x4xf32>
    %25 = vector.shape_cast %24 : vector<1x1x1x4xf32> to vector<4xf32>
    %26 = vector.shape_cast %23 : vector<4xf32> to vector<1x1x1x4xf32>
    tpu.vector_store %arg5[%c0_12, %c0_13, %c3_14, %c0_15], %26 {strides = array<i32>} : memref<1x1x5x4xf32, #tpu.memory_space<vmem>>, vector<1x1x1x4xf32>,
    %27 = tpu.reciprocal %13 {approx = true} : vector<1x256xf32> -> vector<1x256xf32>
    %28 = arith.mulf %13, %27 : vector<1x256xf32>
    %cst_16 = arith.constant 2.000000e+00 : f32
    %29 = vector.broadcast %cst_16 : f32 to vector<1x256xf32>
    %30 = arith.subf %29, %28 : vector<1x256xf32>
    %31 = arith.mulf %27, %30 : vector<1x256xf32>
    %32 = vector.broadcast %31 : vector<1x256xf32> to vector<4x256xf32>
    %33 = arith.mulf %11, %32 : vector<4x256xf32>
    %c0_17 = arith.constant 0 : index
    %c0_18 = arith.constant 0 : index
    %c0_19 = arith.constant 0 : index
    %c0_20 = arith.constant 0 : index
    %34 = vector.load %arg5[%c0_17, %c0_18, %c0_19, %c0_20] : memref<1x1x5x4xf32, #tpu.memory_space<vmem>>, vector<1x1x1x4xf32>
    %35 = vector.shape_cast %34 : vector<1x1x1x4xf32> to vector<4xf32>
    %cst_21 = arith.constant dense<0.000000e+00> : vector<4xf32>
    %36 = vector.multi_reduction <add>, %6, %cst_21 [1] : vector<4x256xf32> to vector<4xf32>
    %37 = arith.addf %35, %36 : vector<4xf32>
    %c0_22 = arith.constant 0 : index
    %c0_23 = arith.constant 0 : index
    %c0_24 = arith.constant 0 : index
    %c0_25 = arith.constant 0 : index
    %38 = vector.load %arg5[%c0_22, %c0_23, %c0_24, %c0_25] : memref<1x1x5x4xf32, #tpu.memory_space<vmem>>, vector<1x1x1x4xf32>
    %39 = vector.shape_cast %38 : vector<1x1x1x4xf32> to vector<4xf32>
    %40 = vector.shape_cast %37 : vector<4xf32> to vector<1x1x1x4xf32>
    tpu.vector_store %arg5[%c0_22, %c0_23, %c0_24, %c0_25], %40 {strides = array<i32>} : memref<1x1x5x4xf32, #tpu.memory_space<vmem>>, vector<1x1x1x4xf32>,
    %c0_26 = arith.constant 0 : index
    %c0_27 = arith.constant 0 : index
    %c1 = arith.constant 1 : index
    %c0_28 = arith.constant 0 : index
    %41 = vector.load %arg5[%c0_26, %c0_27, %c1, %c0_28] : memref<1x1x5x4xf32, #tpu.memory_space<vmem>>, vector<1x1x1x4xf32>
    %42 = vector.shape_cast %41 : vector<1x1x1x4xf32> to vector<4xf32>
    %43 = arith.mulf %6, %33 : vector<4x256xf32>
    %cst_29 = arith.constant dense<0.000000e+00> : vector<4xf32>
    %44 = vector.multi_reduction <add>, %43, %cst_29 [1] : vector<4x256xf32> to vector<4xf32>
    %45 = arith.addf %42, %44 : vector<4xf32>
    %c0_30 = arith.constant 0 : index
    %c0_31 = arith.constant 0 : index
    %c1_32 = arith.constant 1 : index
    %c0_33 = arith.constant 0 : index
    %46 = vector.load %arg5[%c0_30, %c0_31, %c1_32, %c0_33] : memref<1x1x5x4xf32, #tpu.memory_space<vmem>>, vector<1x1x1x4xf32>
    %47 = vector.shape_cast %46 : vector<1x1x1x4xf32> to vector<4xf32>
    %48 = vector.shape_cast %45 : vector<4xf32> to vector<1x1x1x4xf32>
    tpu.vector_store %arg5[%c0_30, %c0_31, %c1_32, %c0_33], %48 {strides = array<i32>} : memref<1x1x5x4xf32, #tpu.memory_space<vmem>>, vector<1x1x1x4xf32>,
    %c0_34 = arith.constant 0 : index
    %c0_35 = arith.constant 0 : index
    %c2 = arith.constant 2 : index
    %c0_36 = arith.constant 0 : index
    %49 = vector.load %arg5[%c0_34, %c0_35, %c2, %c0_36] : memref<1x1x5x4xf32, #tpu.memory_space<vmem>>, vector<1x1x1x4xf32>
    %50 = vector.shape_cast %49 : vector<1x1x1x4xf32> to vector<4xf32>
    %cst_37 = arith.constant dense<0.000000e+00> : vector<4xf32>
    %51 = vector.multi_reduction <add>, %33, %cst_37 [1] : vector<4x256xf32> to vector<4xf32>
    %52 = arith.addf %50, %51 : vector<4xf32>
    %c0_38 = arith.constant 0 : index
    %c0_39 = arith.constant 0 : index
    %c2_40 = arith.constant 2 : index
    %c0_41 = arith.constant 0 : index
    %53 = vector.load %arg5[%c0_38, %c0_39, %c2_40, %c0_41] : memref<1x1x5x4xf32, #tpu.memory_space<vmem>>, vector<1x1x1x4xf32>
    %54 = vector.shape_cast %53 : vector<1x1x1x4xf32> to vector<4xf32>
    %55 = vector.shape_cast %52 : vector<4xf32> to vector<1x1x1x4xf32>
    tpu.vector_store %arg5[%c0_38, %c0_39, %c2_40, %c0_41], %55 {strides = array<i32>} : memref<1x1x5x4xf32, #tpu.memory_space<vmem>>, vector<1x1x1x4xf32>,
    %56 = arith.subf %33, %6 : vector<4x256xf32>
    %c0_42 = arith.constant 0 : index
    %c0_43 = arith.constant 0 : index
    %c4 = arith.constant 4 : index
    %c0_44 = arith.constant 0 : index
    %57 = vector.load %arg5[%c0_42, %c0_43, %c4, %c0_44] : memref<1x1x5x4xf32, #tpu.memory_space<vmem>>, vector<1x1x1x4xf32>
    %58 = vector.shape_cast %57 : vector<1x1x1x4xf32> to vector<4xf32>
    %59 = arith.mulf %56, %56 : vector<4x256xf32>
    %cst_45 = arith.constant dense<0.000000e+00> : vector<4xf32>
    %60 = vector.multi_reduction <add>, %59, %cst_45 [1] : vector<4x256xf32> to vector<4xf32>
    %61 = arith.addf %58, %60 : vector<4xf32>
    %c0_46 = arith.constant 0 : index
    %c0_47 = arith.constant 0 : index
    %c4_48 = arith.constant 4 : index
    %c0_49 = arith.constant 0 : index
    %62 = vector.load %arg5[%c0_46, %c0_47, %c4_48, %c0_49] : memref<1x1x5x4xf32, #tpu.memory_space<vmem>>, vector<1x1x1x4xf32>
    %63 = vector.shape_cast %62 : vector<1x1x1x4xf32> to vector<4xf32>
    %64 = vector.shape_cast %61 : vector<4xf32> to vector<1x1x1x4xf32>
    tpu.vector_store %arg5[%c0_46, %c0_47, %c4_48, %c0_49], %64 {strides = array<i32>} : memref<1x1x5x4xf32, #tpu.memory_space<vmem>>, vector<1x1x1x4xf32>,
    return
  }
  func.func @transform_0(%arg0: i32, %arg1: i32, %arg2: i32) -> (i32, i32, i32) {
    %c1_i32 = arith.constant 1 : i32
    %0 = arith.muli %arg1, %c1_i32 : i32
    %1 = arith.addi %0, %arg2 : i32
    %c0_i32 = arith.constant 0 : i32
    %c0_i32_0 = arith.constant 0 : i32
    return %arg0, %c0_i32, %1 : i32, i32, i32
  }
  func.func @transform_1(%arg0: i32, %arg1: i32, %arg2: i32) -> (i32, i32, i32) {
    %c1_i32 = arith.constant 1 : i32
    %0 = arith.muli %arg1, %c1_i32 : i32
    %1 = arith.addi %0, %arg2 : i32
    %c0_i32 = arith.constant 0 : i32
    %c0_i32_0 = arith.constant 0 : i32
    return %arg0, %c0_i32, %1 : i32, i32, i32
  }
  func.func @transform_2(%arg0: i32, %arg1: i32, %arg2: i32) -> (i32, i32, i32, i32) {
    %c0_i32 = arith.constant 0 : i32
    %c0_i32_0 = arith.constant 0 : i32
    %c0_i32_1 = arith.constant 0 : i32
    return %arg0, %arg1, %c0_i32, %c0_i32_0 : i32, i32, i32, i32
  }
}

</mosaic_0001>

<bundles_post_ra>
// kernel: tpu_custom_call.1
= control target key start
LH: loop header
LB: loop body
LE: loop exit
PB: predicated region body
PF: predicated region fallthrough
CT: control target
= control target key end

     0   :  { %7 = vsyncpa [#allocation3], 0  ;;  %s912_s0 = inlined_call_operand.hbm [shape: f32[2,4,256], index: 0, kind: input, shape index: {}]   ;;  %s913_s1 = inlined_call_operand.hbm [shape: f32[2,4,256], index: 1, kind: input, shape index: {}]   ;;  %s914_s2 = inlined_call_operand.vmem [shape: f32[2,1,5,4], index: 2, kind: output, shape index: {}]  }
   0x1   :  { %9 = vsyncpa [#allocation3 + $0x1], 0 }
   0x2   :  { %10 = vsyncpa [#allocation5], 0 }
   0x3   :  { %12 = vsyncpa [#allocation5 + $0x1], 0  ;;  %s746_s9 = smov 0   ;;  %s748_s10 = smov 0  }
   0x4   :  { %s750_s11 = smov 0   ;;  %s752_s12 = smov 0  }
   0x5   :  { %s754_s13 = smov 0   ;;  %s756_s14 = smov 0  }
   0x6 LB: > { %s525_s15 = sadd.s32 4294967295, %s726_s14   ;;  %s37_s16 = sadd.s32 1, %s722_s13  ;;  %s726_s14 = sphi %s756_s14, %s18_s14   ;;  %s722_s13 = sphi %s754_s13, %s923_s13   ;;  %s718_s12 = sphi %s752_s12, %s922_s12   ;;  %s714_s11 = sphi %s750_s11, %s921_s11   ;;  %s710_s10 = sphi %s748_s10, %s920_s10   ;;  %s706_s9 = sphi %s746_s9, %s919_s9  }
   0x7   : > { %p39_p0 = scmp.ge.s32.totalorder %s37_s16, 2  ;;  %s48_s17 = sadd.s32 1, %s714_s11 }
   0x8   : > { %p55_p1 = scmp.ne.s32.totalorder %s714_s11, %s710_s10  ;;  %p56_p2 = scmp.eq.s32.totalorder %s726_s14, 0 }
   0x9   : > { %s925_s16 = smov (%p39_p0, %s37_s16), 0  ;;  %p61_p4 = scmp.ne.s32.totalorder %s710_s10, %s706_s9 }
   0xa   : > { %p782_p3 = por %p56_p2, %p55_p1  ;;  %s43_s19 = ssub.s32 %s722_s13, %s925_s16 }
   0xb   : > { %p62_p5 = scmp.eq.s32.totalorder %s525_s15, 0  ;;  %p46_p6 = scmp.eq.s32.totalorder %s43_s19, 0 }
   0xc   : > { %p554_p8 = scmp.lt.s32.totalorder %s726_s14, 2  ;;  %s798_s22 = sand.u32 1, %s714_s11  }
   0xd   : > { %p789_p7 = por %p62_p5, %p61_p4  ;;  %s541_s23 = sshll.u32 %s722_s13, 7 }
   0xe   : > { %s795_s21 = scalar_select %p46_p6, %s714_s11, %s48_s17  }
   0xf   : > { %s529_s24 = sshll.u32 %s798_s22, 3  ;;  %s156_s27 = scalar_lea.hbm %s912_s0, %s541_s23 }
  0x10   : > { %s147_s28 = scalar_lea.vmem [#allocation2], %s529_s24  ;;  %p807_p9 = pnand %p554_p8, %p782_p3 }
  0x11   : > { %s158_s29 = sshll.u32 %s147_s28, 4  ;;  %p535_p10 = scmp.ge.s32.totalorder %s726_s14, 1  ;;  %s159_s29 = int_to_ptr.vmem [resolvable:$true] %s158_s29 }
  0x12   : > { %p185_p11 = scmp.lt.s32.totalorder %s726_s14, 3  ;;  %s144_s3 = scalar_lea.sflag [#allocation3], %s798_s22 }
  0x13   : > { %p618_p12 = pneg %p807_p9  ;;  %s629_s4 = scalar_lea.vmem %s159_s29, 128 }
  0x14   : > { %p630_p13 = scmp.ne.s32.totalorder %s159_s29, %s629_s4  ;;  %s728_s5 = smov [#allocation2]  }
  0x15   : > { %s634_s6 = sshll.u32 %s728_s5, 4  ;;  %s635_s6 = int_to_ptr.vmem [resolvable:$false] %s634_s6 }
  0x16   : > { %p632_p0 = pnand %p630_p13, %p618_p12  ;;  %s636_s7 = scalar_lea.vmem %s635_s6, 256 }
  0x17   : > { %p637_p2 = scmp.lt.s32.totalorder %s159_s29, %s635_s6  ;;  %p638_p3 = scmp.lt.s32.totalorder %s636_s7, %s629_s4 }
  0x18   : > { %p633_p1 = pneg %p632_p0 }
  0x19   : > { %p639_p4 = por %p638_p3, %p637_p2 }
  0x1b   : > { %p640_p5 = pnand %p639_p4, %p633_p1 }
  0x1d   : > { %643 = shalt.err (!%p640_p5)
}
  0x1e   : > { %550 = dma.hbm_to_vmem [thread:$0]  (!%p807_p9), %s156_s27, 128, %s159_s29, %s144_s3  }
  0x1f   : > { %p825_p6 = pnand %p535_p10, %p185_p11  ;;  %s178_s17 = scalar_lea.hbm %s913_s1, %s541_s23 }
  0x20   : > { %s169_s18 = scalar_lea.vmem [#allocation4], %s529_s24  ;;  %s166_s25 = scalar_lea.sflag [#allocation5], %s798_s22 }
  0x21   : > { %s180_s19 = sshll.u32 %s169_s18, 4  ;;  %s729_s27 = smov [#allocation4]   ;;  %s181_s19 = int_to_ptr.vmem [resolvable:$true] %s180_s19 }
  0x22   : > { %s657_s26 = scalar_lea.vmem %s181_s19, 128  ;;  %s662_s28 = sshll.u32 %s729_s27, 4  ;;  %s663_s28 = int_to_ptr.vmem [resolvable:$false] %s662_s28 }
  0x23   : > { %p658_p8 = scmp.ne.s32.totalorder %s181_s19, %s657_s26  ;;  %s664_s29 = scalar_lea.vmem %s663_s28, 256 }
  0x24   : > { %p665_p10 = scmp.lt.s32.totalorder %s181_s19, %s663_s28  ;;  %p666_p11 = scmp.lt.s32.totalorder %s664_s29, %s657_s26 }
  0x25   : > { %p660_p13 = pnand %p658_p8, %p618_p12 }
  0x26   : > { %p667_p1 = por %p666_p11, %p665_p10 }
  0x27   : > { %p661_p0 = pneg %p660_p13 }
  0x29   : > { %p668_p2 = pnand %p667_p1, %p661_p0 }
  0x2b   : > { %671 = shalt.err (!%p668_p2)
}
  0x2c   : > { %553 = dma.hbm_to_vmem [thread:$0]  (!%p807_p9), %s178_s17, 128, %s181_s19, %s166_s25  }
  0x2d   : > { %189 = sbr.rel (%p825_p6) target bundleno = 283 (0x11b), region = 28  ;;  %s191_s22 = sand.u32 (!%p825_p6), 1, %s710_s10  }
  0x2e   : > { %s536_s23 = sshll.u32 (!%p825_p6), %s191_s22, 3  ;;  %s192_s24 = scalar_lea.sflag (!%p825_p6), [#allocation3], %s191_s22 }
  0x2f   : > { %s195_s3 = scalar_lea.vmem (!%p825_p6), [#allocation2], %s536_s23 }
  0x32   : > { %697 = dma.done.wait (%p789_p7), %s192_s24, 128  }
  0x33   : > { %699 = vsyncadd (%p789_p7), %s192_s24, 4294967168  ;;  %s201_s4 = scalar_lea.sflag [#allocation5], %s191_s22  ;;  %s204_s5 = scalar_lea.vmem [#allocation4], %s536_s23 }
  0x34   : > { %701 = dma.done.wait (%p789_p7), %s201_s4, 128  }
  0x35   : > { %703 = vsyncadd (%p789_p7), %s201_s4, 4294967168  ;;  %p236_p9 = scmp.lt.s32.totalorder %s718_s12, 1  ;;  %vm247_vm0 = vcmask 28672   ;;  %vm254_vm1 = vcmask 1043456   ;;  %v730_v0 = vmov 0.0   ;;  %v857_v1 = vld [vmem:[%s204_s5] sm:$0xff] }
  0x36   : > { %v249_v2 = vld [vmem:[%s195_s3] sm:$0xff]  ;;  %v339_v3 = vcombine.high %v857_v1, %v857_v1  ;;  %v341_v4 = vsel %vm254_vm1, %v857_v1, 0.0  ;;  %v303_v53 = vsub.f32 0.0, %v857_v1  ;;  %vm322_vm2 = vcmask 24576  }
  0x37   : > { %s927_s12 = smov (!%p236_p9, %s718_s12), 1  ;;  %v252_v5 = vcombine.high %v249_v2, %v249_v2  ;;  %v255_v6 = vsel %vm254_vm1, %v249_v2, -inf }
  0x38   : > { %s538_s30 = sshll.u32 %s927_s12, 3  ;;  %v256_v7 = vrot.slane %v255_v6, 4  ;;  %v342_v8 = vsel %vm254_vm1, %v339_v3, 0.0 }
  0x39   : > { %s854_s8 = scalar_lea.vmem %s914_s2, %s538_s30  ;;  %v262_v9 = vsel %vm254_vm1, %v252_v5, -inf  ;;  %v343_v10 = vadd.f32 %v342_v8, %v341_v4 }
  0x3a   : > { %248 = vst.msk [vmem:[%s854_s8] sm:$0x1f] %vm247_vm0, %v730_v0  ;;  %v257_v11 = vmax.f32 %v255_v6, %v256_v7  ;;  %v263_v12 = vrot.slane %v262_v9, 4 }
  0x3b   : > { %344 = vadd.xlane.f32.xlu0 %v343_v10 }
  0x3c   : > { %v258_v13 = vrot.slane %v257_v11, 2  ;;  %v264_v14 = vmax.f32 %v262_v9, %v263_v12 }
  0x3e   : > { %v259_v15 = vmax.f32 %v257_v11, %v258_v13  ;;  %v265_v16 = vrot.slane %v264_v14, 2 }
  0x40   : > { %v260_v17 = vrot.slane %v259_v15, 1  ;;  %v266_v18 = vmax.f32 %v264_v14, %v265_v16  ;;  %v314_v14 = vlaneseq }
  0x42   : > { %v261_v19 = vmax.f32 %v259_v15, %v260_v17  ;;  %v267_v20 = vrot.slane %v266_v18, 1  ;;  %v315_v15 = vand.u32 127, %v314_v14  ;;  %v317_v16 = vshrl.u32 %v314_v14, 7 }
  0x44   : > { %v268_v21 = vmax.f32 %v266_v18, %v267_v20  ;;  %v318_v17 = vsub.s32 %v315_v15, %v317_v16 }
  0x46   : > { %v271_v22 = vcombine.low %v261_v19, %v268_v21  ;;  %v337_v19 = vld [vmem:[%s854_s8] sm:$0x1] }
  0x48   : > { %v273_v23 = vsub.f32 %v249_v2, %v271_v22 }
  0x4a   : > { %v274_v24 = vmul.f32 1.442695, %v273_v23 }
  0x4c   : > { %606 = vpow2.f32 %v274_v24 }
  0x59   : > { %v607_v25 = vpop.eup %606 }
  0x5a   : > { %v277_v26 = vcombine.high %v607_v25, %v607_v25  ;;  %v279_v27 = vsel %vm254_vm1, %v607_v25, 0.0 }
  0x5b   : > { %v280_v28 = vrot.slane %v279_v27, 4 }
  0x5c   : > { %v286_v29 = vsel %vm254_vm1, %v277_v26, 0.0  ;;  %v354_v26 = vld [vmem:[%s854_s8 + $0x1] sm:$0x1] }
  0x5d   : > { %v281_v30 = vadd.f32 %v280_v28, %v279_v27  ;;  %v287_v31 = vrot.slane %v286_v29, 4 }
  0x5f   : > { %v282_v32 = vrot.slane %v281_v30, 2  ;;  %v288_v33 = vadd.f32 %v287_v31, %v286_v29  ;;  %v390_v31 = vld [vmem:[%s854_s8 + $0x4] sm:$0x1] }
  0x61   : > { %v283_v34 = vadd.f32 %v282_v32, %v281_v30  ;;  %v289_v35 = vrot.slane %v288_v33, 2 }
  0x63   : > { %v284_v36 = vrot.slane %v283_v34, 1  ;;  %v290_v37 = vadd.f32 %v289_v35, %v288_v33  ;;  %v372_v33 = vld [vmem:[%s854_s8 + $0x2] sm:$0x1] }
  0x65   : > { %v285_v38 = vadd.f32 %v284_v36, %v283_v34  ;;  %v291_v39 = vrot.slane %v290_v37, 1 }
  0x67   : > { %v292_v40 = vadd.f32 %v291_v39, %v290_v37  ;;  %608 = vrcp.f32 %v285_v38 }
  0x68   : > { %610 = vlog2.f32 %v285_v38 }
  0x69   : > { %612 = vrcp.f32 %v292_v40 }
  0x6a   : > { %614 = vlog2.f32 %v292_v40 }
  0x74   : > { %v609_v41 = vpop.eup %608 }
  0x75   : > { %v611_v42 = vpop.eup %610  ;;  %v326_v43 = vmul.f32 %v609_v41, %v285_v38 }
  0x76   : > { %v613_v44 = vpop.eup %612  ;;  %v294_v45 = vmul.f32 0.6931472, %v611_v42 }
  0x77   : > { %v615_v46 = vpop.eup %614  ;;  %v327_v47 = vmul.f32 %v613_v44, %v292_v40  ;;  %v328_v48 = vsub.f32 2.0, %v326_v43 }
  0x78   : > { %v296_v49 = vmul.f32 0.6931472, %v615_v46 }
  0x79   : > { %v329_v50 = vsub.f32 2.0, %v327_v47  ;;  %v330_v51 = vmul.f32 %v609_v41, %v328_v48 }
  0x7a   : > { %v299_v52 = vcombine.low %v294_v45, %v296_v49 }
  0x7b   : > { %v331_v54 = vmul.f32 %v613_v44, %v329_v50 }
  0x7c   : > { %v301_v55 = vsub.f32 %v273_v23, %v299_v52  ;;  %v302_v23 = vld [vmem:[%s854_s8 + $0x3] sm:$0x1] }
  0x7d   : > { %v334_v56 = vcombine.low %v330_v51, %v331_v54 }
  0x7e   : > { %v304_v57 = vmul.f32 %v303_v53, %v301_v55 }
  0x7f   : > { %v336_v58 = vmul.f32 %v607_v25, %v334_v56 }
  0x80   : > { %v306_v59 = vcombine.high %v304_v57, %v304_v57  ;;  %v308_v60 = vsel %vm254_vm1, %v304_v57, 0.0 }
  0x81   : > { %v355_v61 = vmul.f32 %v336_v58, %v857_v1  ;;  %v374_v62 = vcombine.high %v336_v58, %v336_v58  ;;  %v389_v63 = vsub.f32 %v336_v58, %v857_v1  ;;  %v376_v7 = vsel %vm254_vm1, %v336_v58, 0.0 }
  0x82   : > { %v309_v0 = vsel %vm254_vm1, %v306_v59, 0.0 }
  0x83   : > { %v357_v2 = vcombine.high %v355_v61, %v355_v61  ;;  %v359_v3 = vsel %vm254_vm1, %v355_v61, 0.0  ;;  %v310_v4 = vadd.f32 %v309_v0, %v308_v60  ;;  %v391_v5 = vmul.f32 %v389_v63, %v389_v63 }
  0x84   : > { %v377_v8 = vsel %vm254_vm1, %v374_v62, 0.0 }
  0x85   : > { %v360_v6 = vsel %vm254_vm1, %v357_v2, 0.0  ;;  %311 = vadd.xlane.f32.xlu0 %v310_v4  ;;  %v393_v10 = vcombine.high %v391_v5, %v391_v5  ;;  %v395_v11 = vsel %vm254_vm1, %v391_v5, 0.0  ;;  %v378_v1 = vadd.f32 %v377_v8, %v376_v7 }
  0x86   : > { %v361_v9 = vadd.f32 %v360_v6, %v359_v3 }
  0x87   : > { %v396_v12 = vsel %vm254_vm1, %v393_v10, 0.0 }
  0x88   : > { %362 = vadd.xlane.f32.xlu1 %v361_v9  ;;  %v397_v13 = vadd.f32 %v396_v12, %v395_v11 }
  0x8a   : > { %398 = vadd.xlane.f32.xlu0 %v397_v13 }
  0x8c   : > { %379 = vadd.xlane.f32.xlu1 %v378_v1 }
  0xc4   : > { %v345_v18 = vpop.xlane.xlu0 %344 }
  0xc5   : > { %v350_v20 = vrot.slane %v345_v18, %v318_v17 }
  0xc7   : > { %v352_v21 = vadd.f32 %v350_v20, %v337_v19 }
  0xc9   : > { %353 = vst.msk [vmem:[%s854_s8] sm:$0x1] %vm322_vm2, %v352_v21 }
 0x10e   : > { %v312_v22 = vpop.xlane.xlu0 %311 }
 0x10f   : > { %v319_v24 = vrot.slane %v312_v22, %v318_v17 }
 0x111   : > { %v363_v25 = vpop.xlane.xlu1 %362  ;;  %v321_v27 = vadd.f32 %v319_v24, %v302_v23 }
 0x112   : > { %v368_v28 = vrot.slane %v363_v25, %v318_v17 }
 0x113   : > { %323 = vst.msk [vmem:[%s854_s8 + $0x3] sm:$0x1] %vm322_vm2, %v321_v27  ;;  %v399_v30 = vpop.xlane.xlu0 %398 }
 0x114   : > { %v370_v29 = vadd.f32 %v368_v28, %v354_v26  ;;  %v404_v34 = vrot.slane %v399_v30, %v318_v17 }
 0x115   : > { %v380_v32 = vpop.xlane.xlu1 %379 }
 0x116   : > { %371 = vst.msk [vmem:[%s854_s8 + $0x1] sm:$0x1] %vm322_vm2, %v370_v29  ;;  %v385_v35 = vrot.slane %v380_v32, %v318_v17  ;;  %v406_v36 = vadd.f32 %v404_v34, %v390_v31 }
 0x118   : > { %v387_v37 = vadd.f32 %v385_v35, %v372_v33  ;;  %407 = vst.msk [vmem:[%s854_s8 + $0x4] sm:$0x1] %vm322_vm2, %v406_v36 }
 0x11a   : > { %388 = vst.msk [vmem:[%s854_s8 + $0x2] sm:$0x1] %vm322_vm2, %v387_v37 }
 0x11b PF: > { %s18_s14 = sadd.s32 1, %s726_s14   ;;  %s919_s9 = smov %s710_s10 }
 0x11c   : > { %p15_p7 = scmp.ge.s32.totalorder %s18_s14, 4   ;;  %s920_s10 = smov %s714_s11 }
 0x11d   : > { %s921_s11 = smov %s795_s21  ;;  %s922_s12 = smov %s722_s13 }
 0x11e   : > { %s923_s13 = smov %s925_s16  ;;  %17 = sbr.rel (!%p15_p7) target bundleno = 6 (0x6), region = 85 }
 0x123   :  { %433 = vsyncpa [#allocation3], 1 }
 0x124   :  { %435 = vsyncpa [#allocation3 + $0x1], 1 }
 0x125   :  { %436 = vsyncpa [#allocation5], 1 }
 0x126   :  { %438 = vsyncpa [#allocation5 + $0x1], 1 }

</bundles_post_ra>
